<compile_context>
chip_gen: v6e
topology: v6e:2x2x1
jax: 0.10.0
libtpu: 0.0.40
codegen_flags: <defaults>
</compile_context>

<pallas_src>
import functools

import jax
import jax.numpy as jnp
from jax.experimental import pallas as pl
from jax.experimental.pallas import tpu as pltpu

_LANES = 128
_SUBLANES = 8


def _round_up(x, m):
    return -(-x // m) * m


def _vmem_capacity_bytes():
    """Physical VMEM of the local chip; conservative v7x fallback if unknown."""
    try:
        return int(pltpu.get_tpu_info().vmem_capacity_bytes)
    except Exception:
        return 64 * 1024 * 1024


def _choose_row_tiling(flat_len, itemsize_v, itemsize_x, vmem_cap):
    """Pick (r_pad, r_blk) for the (rows, 128) packed layout.

    * rows is padded to a multiple of 8 (sublane granularity).
    * r_blk is capped by a VMEM budget (~1/8 of capacity for the pair of
      streamed blocks, leaving room for double buffering + output).
    * when rows > 8, r_blk is also capped so the parallel grid axis has >= 2
      steps -> both v7x TensorCores get a DMA stream.
    """
    rows = _round_up(pl.cdiv(flat_len, _LANES), _SUBLANES)
    bytes_per_row = _LANES * (itemsize_v + itemsize_x)
    max_rows_budget = max(
        _SUBLANES, ((vmem_cap // 8) // bytes_per_row) // _SUBLANES * _SUBLANES)
    if rows <= _SUBLANES:
        max_rows_parallel = rows
    else:
        max_rows_parallel = _round_up(pl.cdiv(rows, 2), _SUBLANES)
    r_blk = int(min(rows, max_rows_budget, max_rows_parallel))
    r_pad = _round_up(rows, r_blk)
    return r_pad, r_blk


def _pack_rows(x_flat, r_pad):
    """(..., L) -> (..., r_pad, 128), zero padded, dtype preserved."""
    l = x_flat.shape[-1]
    pad = r_pad * _LANES - l
    x = jnp.pad(x_flat, [(0, 0)] * (x_flat.ndim - 1) + [(0, pad)])
    return x.reshape(x_flat.shape[:-1] + (r_pad, _LANES))


def _closed_form_energy_kernel(vnew_ref, xbar_ref, out_ref, *, c_sum):
    """grid = (row_chunks,) [parallel].

    vnew_ref : VMEM (r_blk, 128)  vert_new row chunk, native dtype
    xbar_ref : VMEM (r_blk, 128)  precomputed x_bar row chunk, f32
    out_ref  : VMEM (8, 128) f32  per-chunk partials of c_sum*v^2 - 2*v*x_bar

    Zero-padded tail rows contribute exactly 0 (both operands padded with 0).
    """
    v = vnew_ref[...].astype(jnp.float32)        # in-kernel upcast only
    xb = xbar_ref[...]
    e = (c_sum * v) * v - 2.0 * v * xb           # (r_blk, 128), pure VALU
    r_blk = e.shape[0]
    if r_blk == _SUBLANES:                       # static Python branch
        folded = e
    else:                                        # vreg-aligned sublane fold
        folded = jnp.sum(e.reshape(r_blk // _SUBLANES, _SUBLANES, _LANES), axis=0)
    out_ref[...] = folded                        # single lane-dense store


@functools.partial(jax.jit,
                   static_argnames=("r_blk", "c_sum", "vmem_limit_bytes"))
def _closed_form_energy(vnew_packed, xbar_packed, k, *,
                        r_blk, c_sum, vmem_limit_bytes):
    r_pad = vnew_packed.shape[0]
    n_chunks = r_pad // r_blk
    kernel = functools.partial(_closed_form_energy_kernel, c_sum=c_sum)

    partials = pl.pallas_call(
        kernel,
        out_shape=jax.ShapeDtypeStruct((n_chunks * _SUBLANES, _LANES),
                                       jnp.float32),
        grid_spec=pltpu.PrefetchScalarGridSpec(
            num_scalar_prefetch=0,
            grid=(n_chunks,),
            in_specs=[
                pl.BlockSpec((r_blk, _LANES), lambda r: (r, 0)),   # vert_new
                pl.BlockSpec((r_blk, _LANES), lambda r: (r, 0)),   # x_bar
            ],
            out_specs=pl.BlockSpec((_SUBLANES, _LANES), lambda r: (r, 0)),
        ),
        compiler_params=pltpu.CompilerParams(
            dimension_semantics=("parallel",),
            vmem_limit_bytes=vmem_limit_bytes,
        ),
    )(vnew_packed, xbar_packed)

    return jnp.sum(partials) + k


class InterpolationModuleSingle:
    """JAX/Pallas port: interpolation as weighted combination X^* = sum_i lambda_i X_i."""

    def __init__(self, shape_array, interpolation_coeff):
        coeffs = jnp.asarray(interpolation_coeff, dtype=jnp.float32)
        assert bool(jnp.all(coeffs >= 0)) and abs(float(jnp.sum(coeffs)) - 1.0) < 1e-6, (
            "interpolation coeffs need to prescribe a discrete probability distribution")
        self.shape_array = jnp.asarray(shape_array)          # (N, V, D), native dtype
        self.interpolation_coeff = coeffs                    # (N,)

        n, v, d = self.shape_array.shape
        self._flat_len = v * d
        self._c_sum = float(jnp.sum(coeffs))                 # ~1.0, baked statically

        # Closed-form precompute over the static shapes: one pass at __init__
        # (plain XLA — not the hot path).  x_bar in f32 for accuracy.
        shapes_f32 = self.shape_array.reshape(n, self._flat_len).astype(jnp.float32)
        x_bar = jnp.einsum("n,nf->f", coeffs, shapes_f32)                     # (V*D,)
        self._k = jnp.einsum("n,nf,nf->", coeffs, shapes_f32, shapes_f32)     # scalar

        vmem_cap = _vmem_capacity_bytes()
        self._vmem_limit_bytes = int(min(vmem_cap * 3 // 4, 96 * 1024 * 1024))
        itemsize_v = jnp.dtype(self.shape_array.dtype).itemsize
        self._r_pad, self._r_blk = _choose_row_tiling(
            self._flat_len, itemsize_v, 4, vmem_cap)

        # x_bar is static: pack/pad it exactly once into the (8,128)-dense layout.
        self._xbar_packed = _pack_rows(x_bar, self._r_pad)   # (r_pad, 128) f32

        self.vert_new = self.average_vertex()                # Parameter analogue

    def average_vertex(self):
        # Plain-JAX glue (parameter init, not the hot path).
        return jnp.mean(self.shape_array, axis=0)

    def reset_vert_new(self):
        self.vert_new = self.average_vertex()

    def set_vert_new(self, vert):
        self.vert_new = jnp.asarray(vert, dtype=self.shape_array.dtype)

    def forward(self):
        vnew_packed = _pack_rows(self.vert_new.reshape(self._flat_len), self._r_pad)
        e_total = _closed_form_energy(
            vnew_packed, self._xbar_packed, self._k,
            r_blk=self._r_blk, c_sum=self._c_sum,
            vmem_limit_bytes=self._vmem_limit_bytes)
        return (e_total, [e_total])


if __name__ == "__main__":
    key = jax.random.PRNGKey(0)
    k0, k1 = jax.random.split(key)

    # --- small case: 4 shapes, 64 vertices, 3-D coords (single row chunk) ---
    N, V, D = 4, 64, 3
    shapes = jax.random.normal(k0, (N, V, D), dtype=jnp.float32)
    coeffs = jnp.full((N,), 1.0 / N, dtype=jnp.float32)

    module = InterpolationModuleSingle(shapes, coeffs)
    module.set_vert_new(module.vert_new + 0.1)   # nonzero energy, deterministic

    e_total, e_list = module.forward()
    e_total = jax.block_until_ready(e_total)

    diff = module.vert_new[None, :, :].astype(jnp.float32) - shapes.astype(jnp.float32)
    e_ref = jnp.sum(coeffs * jnp.sum(diff * diff, axis=(1, 2)))
    assert jnp.allclose(e_total, e_ref, rtol=1e-5, atol=1e-5), (e_total, e_ref)
    assert len(e_list) == 1 and jnp.allclose(e_list[0], e_total)

    # --- multi-chunk case: exercises the >=2-step parallel axis and row padding ---
    N2, V2, D2 = 3, 1024, 3
    shapes2 = jax.random.normal(k1, (N2, V2, D2), dtype=jnp.float32)
    coeffs2 = jnp.asarray([0.5, 0.3, 0.2], dtype=jnp.float32)

    module2 = InterpolationModuleSingle(shapes2, coeffs2)
    module2.set_vert_new(module2.vert_new * 0.9 + 0.05)

    e2, e2_list = module2.forward()
    e2 = jax.block_until_ready(e2)

    diff2 = module2.vert_new[None, :, :].astype(jnp.float32) - shapes2.astype(jnp.float32)
    e2_ref = jnp.sum(coeffs2 * jnp.sum(diff2 * diff2, axis=(1, 2)))
    assert jnp.allclose(e2, e2_ref, rtol=1e-4, atol=1e-4), (e2, e2_ref)
    assert len(e2_list) == 1 and jnp.allclose(e2_list[0], e2)

    print("KERNEL_OK")
</pallas_src>

<mosaic_0001>
module attributes {stable_mosaic.version = 11 : i64} {
  func.func @_closed_form_energy_kernel(%arg0: i32, %arg1: memref<8x128xf32, #tpu.memory_space<vmem>>, %arg2: memref<8x128xf32, #tpu.memory_space<vmem>>, %arg3: memref<8x128xf32, #tpu.memory_space<vmem>>) attributes {dimension_semantics = [#tpu.dimension_semantics<parallel>], iteration_bounds = array<i64: 1>, scalar_prefetch = 0 : i64, scratch_operands = 0 : i64, tpu.core_type = #tpu.core_type<tc>, window_params = [{transform_indices = @transform_0, window_bounds = array<i64: 8, 128>}, {transform_indices = @transform_1, window_bounds = array<i64: 8, 128>}, {transform_indices = @transform_2, window_bounds = array<i64: 8, 128>}]} {
    %c0 = arith.constant 0 : index
    %c0_0 = arith.constant 0 : index
    %0 = vector.load %arg1[%c0, %c0_0] : memref<8x128xf32, #tpu.memory_space<vmem>>, vector<8x128xf32>
    %c0_1 = arith.constant 0 : index
    %c0_2 = arith.constant 0 : index
    %1 = vector.load %arg2[%c0_1, %c0_2] : memref<8x128xf32, #tpu.memory_space<vmem>>, vector<8x128xf32>
    %cst = arith.constant 1.000000e+00 : f32
    %2 = vector.broadcast %cst : f32 to vector<8x128xf32>
    %3 = arith.mulf %2, %0 : vector<8x128xf32>
    %4 = arith.mulf %3, %0 : vector<8x128xf32>
    %cst_3 = arith.constant 2.000000e+00 : f32
    %5 = vector.broadcast %cst_3 : f32 to vector<8x128xf32>
    %6 = arith.mulf %5, %0 : vector<8x128xf32>
    %7 = arith.mulf %6, %1 : vector<8x128xf32>
    %8 = arith.subf %4, %7 : vector<8x128xf32>
    %c0_4 = arith.constant 0 : index
    %c0_5 = arith.constant 0 : index
    %9 = vector.load %arg3[%c0_4, %c0_5] : memref<8x128xf32, #tpu.memory_space<vmem>>, vector<8x128xf32>
    tpu.vector_store %arg3[%c0_4, %c0_5], %8 {strides = array<i32>} : memref<8x128xf32, #tpu.memory_space<vmem>>, vector<8x128xf32>,
    return
  }
  func.func @transform_0(%arg0: i32) -> (i32, i32) {
    %c0_i32 = arith.constant 0 : i32
    %c0_i32_0 = arith.constant 0 : i32
    return %arg0, %c0_i32 : i32, i32
  }
  func.func @transform_1(%arg0: i32) -> (i32, i32) {
    %c0_i32 = arith.constant 0 : i32
    %c0_i32_0 = arith.constant 0 : i32
    return %arg0, %c0_i32 : i32, i32
  }
  func.func @transform_2(%arg0: i32) -> (i32, i32) {
    %c0_i32 = arith.constant 0 : i32
    %c0_i32_0 = arith.constant 0 : i32
    return %arg0, %c0_i32 : i32, i32
  }
}

</mosaic_0001>

<bundles_post_ra>
// kernel: _closed_form_energy.1
= control target key start
LH: loop header
LB: loop body
LE: loop exit
PB: predicated region body
PF: predicated region fallthrough
CT: control target
= control target key end

     0   :  { %7 = vsyncpa [#allocation3], 0  ;;  %s120_s0 = inlined_call_operand.hbm [shape: f32[8,128], index: 0, kind: input, shape index: {}]   ;;  %s121_s1 = inlined_call_operand.hbm [shape: f32[8,128], index: 1, kind: input, shape index: {}]   ;;  %s122_s2 = inlined_call_operand.vmem [shape: f32[8,128], index: 2, kind: output, shape index: {}]  }
   0x1   :  { %8 = vsyncpa [#allocation5], 0  ;;  %s94_s9 = smov [#allocation2]   ;;  %s95_s11 = smov [#allocation4]  }
   0x2   :  { %s15_s10 = sshll.u32 %s94_s9, 4  ;;  %s25_s12 = sshll.u32 %s95_s11, 4  ;;  %s16_s10 = int_to_ptr.vmem [resolvable:$true] %s15_s10  ;;  %s26_s12 = int_to_ptr.vmem [resolvable:$true] %s25_s12 }
   0x3   :  { %s58_s13 = scalar_lea.vmem %s16_s10, 128  ;;  %p63_p1 = scmp.lt.s32.totalorder %s16_s10, %s16_s10 }
   0x4   :  { %p59_p0 = scmp.ne.s32.totalorder %s16_s10, %s58_s13  ;;  %p64_p2 = scmp.lt.s32.totalorder %s58_s13, %s58_s13 }
   0x6   :  { %p65_p3 = por %p64_p2, %p63_p1 }
   0x8   :  { %p66_p4 = pnand %p65_p3, %p59_p0 }
   0xa   :  { %69 = shalt.err (!%p66_p4)
}
   0xb   :  { %18 = dma.hbm_to_vmem [thread:$0]  %s120_s0, 128, %s16_s10, [#allocation3]  }
   0xc   :  { %s78_s16 = scalar_lea.vmem %s26_s12, 128  ;;  %p83_p6 = scmp.lt.s32.totalorder %s26_s12, %s26_s12 }
   0xd   :  { %p79_p5 = scmp.ne.s32.totalorder %s26_s12, %s78_s16  ;;  %p84_p7 = scmp.lt.s32.totalorder %s78_s16, %s78_s16 }
   0xf   :  { %p85_p8 = por %p84_p7, %p83_p6 }
  0x11   :  { %p86_p9 = pnand %p85_p8, %p79_p5 }
  0x13   :  { %89 = shalt.err (!%p86_p9)
}
  0x14   :  { %28 = dma.hbm_to_vmem [thread:$0]  %s121_s1, 128, %s26_s12, [#allocation5]  }
  0x15   :  { %90 = dma.done.wait [#allocation3], 128  }
  0x16   :  { %91 = vsyncadd [#allocation3], 4294967168 }
  0x17   :  { %92 = dma.done.wait [#allocation5], 128  }
  0x18   :  { %93 = vsyncadd [#allocation5], 4294967168  ;;  %v35_v0 = vld [vmem:[#allocation2] sm:$0xff]  ;;  %v36_v1 = vld [vmem:[#allocation4] sm:$0xff] }
  0x19   :  { %v37_v2 = vmul.f32 %v35_v0, %v35_v0  ;;  %v38_v3 = vmul.f32 2.0, %v35_v0 }
  0x1b   :  { %v39_v4 = vmul.f32 %v38_v3, %v36_v1 }
  0x1d   :  { %v40_v5 = vsub.f32 %v37_v2, %v39_v4 }
  0x1f   :  { %41 = vst [vmem:[%s122_s2] sm:$0xff] %v40_v5 }
  0x20   :  { %46 = vsyncpa [#allocation3], 1 }
  0x21   :  { %47 = vsyncpa [#allocation5], 1 }

</bundles_post_ra>
